<compile_context>
chip_gen: v7x
topology: tpu7x:2x2x1
jax: 0.10.0
libtpu: 0.0.40
codegen_flags: <defaults>
</compile_context>

<pallas_src>
import functools

import jax
import jax.numpy as jnp
from jax.experimental import pallas as pl
from jax.experimental.pallas import tpu as pltpu


def _round_up(x, m):
    return ((x + m - 1) // m) * m


def _class_attn_kernel(scale, n_tok, cr, crp,
                       x_ref, wkv_ref, wq_ref, wp_ref, bp_ref, p_ref, o_ref):
    bt = x_ref.shape[0]
    c = x_ref.shape[2]

    # In-kernel bf16 cast: x makes exactly one HBM->VMEM trip in its original
    # dtype; the cast runs on the VPU. Flatten is free when N % 8 == 0.
    xb = x_ref[...].astype(jnp.bfloat16)                 # (bt, N, C)
    x2d = xb.reshape(bt * n_tok, c)                      # (bt*N, C)
    xc = xb[:, 0, :]                                     # (bt, C) class-token rows (in-tile)

    # Fused, lane-aligned K/V projection: Wk at lanes [0, Cr), Wv at the next
    # 128-aligned group [crp, crp+Cr). Both slices below are free views.
    kv = jnp.dot(x2d, wkv_ref[...], preferred_element_type=jnp.float32)   # (bt*N, 2*crp) f32
    k = kv[:, :cr].reshape(bt, n_tok, cr)                                 # (bt, N, Cr)
    v = kv[:, crp:crp + cr].reshape(bt, n_tok, cr)                        # (bt, N, Cr)

    # Q projection on the bt class-token rows only (tiny matmul, rows already in VMEM).
    q = jnp.dot(xc, wq_ref[...], preferred_element_type=jnp.float32) * scale   # (bt, Cr)

    # Per-head logits broadcast straight back to channel space with the
    # block-diagonal "same-head" matrix P (exact in bf16):
    #   logits[b,n,c] = sum_{c'} q[b,c'] * k[b,n,c'] * [head(c') == head(c)]
    # One bf16 MXU matmul, no H-lane-padded intermediates.
    qk = (q[:, None, :] * k).astype(jnp.bfloat16)                         # (bt, N, Cr)
    logits = jnp.dot(qk.reshape(bt * n_tok, cr), p_ref[...],
                     preferred_element_type=jnp.float32)
    logits = logits.reshape(bt, n_tok, cr)                                # (bt, N, Cr) f32

    # Segmented softmax over the key axis (per batch element), channel-broadcast,
    # fully in f32. Normalization is fused after the key reduction.
    lmax = jnp.max(logits, axis=1, keepdims=True)                         # (bt, 1, Cr)
    e = jnp.exp(logits - lmax)                                            # (bt, N, Cr)
    denom = jnp.sum(e, axis=1)                                            # (bt, Cr)
    ctx = jnp.sum(e * v, axis=1) * pl.reciprocal(denom, approx=True)      # (bt, Cr)

    # Output projection with bias (bf16 MXU operands, f32 accumulate).
    out = jnp.dot(ctx.astype(wp_ref.dtype), wp_ref[...],
                  preferred_element_type=jnp.float32) + bp_ref[...]       # (bt, C)
    o_ref[...] = out.astype(o_ref.dtype)


def _pick_block_b(batch, n_tokens, target_rows=2048, min_steps=4):
    """Pick a batch tile `bt`.

    Constraints: bt divides B and the (bt, C) output block stays (8,128)-legal
    (bt == B or bt % 8 == 0). Heuristic: aim for ~target_rows flattened
    projection rows (sweep 2048-4096 on v5e/v6e; keep 1024-2048 on v7x's
    64 MiB VMEM) while keeping >= min_steps grid steps so a dual-TC v7x gets
    >= 2 pipelined steps per TensorCore.
    """
    divisors = [d for d in range(1, batch + 1) if batch % d == 0]
    legal = [d for d in divisors if d == batch or d % 8 == 0] or [batch]
    fitting = [d for d in legal if d * n_tokens <= target_rows] or [min(legal)]
    for steps in range(min_steps, 1, -1):
        cands = [d for d in fitting if batch // d >= steps]
        if cands:
            return max(cands)
    return max(fitting)


def _vmem_limit_bytes(bt, n_tok, C, Cr, crp, x_itemsize, out_itemsize):
    """Rough per-step VMEM footprint; request 2x with a 32 MiB floor, 64 MiB cap
    (cap keeps a v6e-sized request inside v7x's physical 64 MiB)."""
    lanes = _round_up(max(Cr, 1), 128)
    pipelined = 2 * (bt * n_tok * C * x_itemsize + bt * C * out_itemsize)
    weights = 2 * (C * 2 * crp * 2 + C * Cr * 2 + Cr * C * 2 + C * 4 + Cr * Cr * 2)
    interm = (bt * n_tok * 2 * crp * 4          # kv accumulator (f32)
              + 5 * bt * n_tok * lanes * 4      # qk / logits / e / e*v slabs (f32, lane-padded)
              + 2 * bt * C * 4)                 # ctx / out (f32)
    est = pipelined + weights + interm
    return int(min(64 * 2 ** 20, max(32 * 2 ** 20, 2 * est)))


def prepare_class_attn_params(wq_t, wk_t, wv_t, wp_t, bp, num_heads, expansion):
    """Build the fused / lane-aligned bf16 weights ONCE (outside the hot path)."""
    C = wq_t.shape[0]
    assert C % expansion == 0
    Cr = C // expansion
    assert Cr % num_heads == 0, "channels-per-head must divide evenly"
    assert wq_t.shape == (C, Cr) and wk_t.shape == (C, Cr) and wv_t.shape == (C, Cr)
    assert wp_t.shape == (Cr, C)

    crp = _round_up(Cr, 128)   # 128-lane-aligned group width inside the fused weight

    wkv = jnp.zeros((C, 2 * crp), jnp.bfloat16)
    wkv = wkv.at[:, :Cr].set(wk_t.astype(jnp.bfloat16))
    wkv = wkv.at[:, crp:crp + Cr].set(wv_t.astype(jnp.bfloat16))

    head_of_c = jnp.arange(Cr) // (Cr // num_heads)
    p = (head_of_c[:, None] == head_of_c[None, :]).astype(jnp.bfloat16)   # block-diag ones

    return dict(
        wkv=wkv,
        wq=wq_t.astype(jnp.bfloat16),
        wp=wp_t.astype(jnp.bfloat16),
        bp=bp.astype(jnp.float32).reshape(1, C),
        p=p,
        crp=crp,
    )


def class_attn(x, params, num_heads, expansion, block_b=None):
    """x: (B, N, C); params from prepare_class_attn_params. Returns (B, 1, C)."""
    B, N, C = x.shape
    assert C % expansion == 0
    Cr = C // expansion
    assert Cr % num_heads == 0
    head_dim = (C // num_heads) // expansion
    scale = head_dim ** (-0.5)
    crp = params["crp"]

    bt = block_b if block_b is not None else _pick_block_b(B, N)
    assert B % bt == 0, "batch tile must divide the batch"

    kernel = functools.partial(_class_attn_kernel, scale, N, Cr, crp)

    flops = (2 * B * N * C * (2 * Cr)       # fused K/V projection
             + 2 * B * C * Cr               # Q projection (class tokens)
             + 2 * B * N * Cr * Cr          # head-broadcast logits matmul (qk @ P)
             + 2 * B * Cr * C)              # output projection
    bytes_accessed = (x.size * x.dtype.itemsize
                      + sum(int(params[k].size) * params[k].dtype.itemsize
                            for k in ("wkv", "wq", "wp", "bp", "p"))
                      + B * C * x.dtype.itemsize)
    cost = pl.CostEstimate(flops=int(flops),
                           transcendentals=int(B * N * Cr + B * Cr),
                           bytes_accessed=int(bytes_accessed))

    vmem_bytes = _vmem_limit_bytes(bt, N, C, Cr, crp,
                                   x.dtype.itemsize, x.dtype.itemsize)

    out2d = pl.pallas_call(
        kernel,
        out_shape=jax.ShapeDtypeStruct((B, C), x.dtype),
        grid_spec=pltpu.PrefetchScalarGridSpec(
            num_scalar_prefetch=0,
            grid=(B // bt,),
            in_specs=[
                pl.BlockSpec((bt, N, C), lambda b: (b, 0, 0)),       # x (single HBM pass)
                pl.BlockSpec((C, 2 * crp), lambda b: (0, 0)),        # Wk|Wv fused, lane-aligned
                pl.BlockSpec((C, Cr), lambda b: (0, 0)),             # Wq
                pl.BlockSpec((Cr, C), lambda b: (0, 0)),             # Wproj
                pl.BlockSpec((1, C), lambda b: (0, 0)),              # bproj
                pl.BlockSpec((Cr, Cr), lambda b: (0, 0)),            # P (same-head matrix)
            ],
            out_specs=pl.BlockSpec((bt, C), lambda b: (b, 0)),       # lane-dense slab
        ),
        compiler_params=pltpu.CompilerParams(
            dimension_semantics=("parallel",),
            vmem_limit_bytes=vmem_bytes),
        cost_estimate=cost,
    )(x, params["wkv"], params["wq"], params["wp"], params["bp"], params["p"])

    return out2d.reshape(B, 1, C)


def class_attn_reference(x, wq_t, wk_t, wv_t, wp_t, bp, num_heads, expansion):
    """Pure-JAX f32 reference mirroring the PyTorch forward (fap=False)."""
    B, N, C = x.shape
    Cr = C // expansion
    hd = Cr // num_heads
    scale = ((C // num_heads) // expansion) ** (-0.5)

    q = x[:, 0] @ wq_t                         # (B, Cr)
    k = x @ wk_t                               # (B, N, Cr)
    v = x @ wv_t                               # (B, N, Cr)

    q = q.reshape(B, 1, num_heads, hd).transpose(0, 2, 1, 3) * scale  # (B,H,1,hd)
    k = k.reshape(B, N, num_heads, hd).transpose(0, 2, 1, 3)          # (B,H,N,hd)
    v = v.reshape(B, N, num_heads, hd).transpose(0, 2, 1, 3)          # (B,H,N,hd)

    attn = jnp.einsum("bhqd,bhkd->bhqk", q, k)
    attn = jax.nn.softmax(attn, axis=-1)
    x_cls = jnp.einsum("bhqk,bhkd->bhqd", attn, v)                     # (B,H,1,hd)
    x_cls = x_cls.transpose(0, 2, 1, 3).reshape(B, 1, Cr)
    return x_cls @ wp_t + bp[None, :, :]


if __name__ == "__main__":
    # Small shapes consistent with the module: dim divisible by num_heads*expansion;
    # B chosen so the batched grid has >= 2 steps (bt = 8, grid = (2,)).
    B, N, dim = 16, 8, 32
    num_heads, expansion = 4, 4
    Cr = dim // expansion

    key = jax.random.PRNGKey(0)
    kx, kq, kk, kv, kp, kb = jax.random.split(key, 6)

    x = jax.random.normal(kx, (B, N, dim), dtype=jnp.float32)

    # PyTorch nn.Linear default init: U(-1/sqrt(fan_in), 1/sqrt(fan_in)).
    bq = 1.0 / (dim ** 0.5)
    wq_t = jax.random.uniform(kq, (dim, Cr), jnp.float32, -bq, bq)   # (in, out)
    wk_t = jax.random.uniform(kk, (dim, Cr), jnp.float32, -bq, bq)
    wv_t = jax.random.uniform(kv, (dim, Cr), jnp.float32, -bq, bq)
    bpj = 1.0 / (Cr ** 0.5)
    wp_t = jax.random.uniform(kp, (Cr, dim), jnp.float32, -bpj, bpj)
    bp = jax.random.uniform(kb, (1, dim), jnp.float32, -bpj, bpj)

    # Fused / lane-aligned bf16 weights built once, outside the per-call path.
    params = prepare_class_attn_params(wq_t, wk_t, wv_t, wp_t, bp, num_heads, expansion)

    out = class_attn(x, params, num_heads, expansion)
    out = jax.block_until_ready(out)

    ref = class_attn_reference(x, wq_t, wk_t, wv_t, wp_t, bp, num_heads, expansion)
    assert out.shape == (B, 1, dim)
    # bf16 MXU operands + approx reciprocal vs f32 reference: bf16-level tolerance.
    assert jnp.allclose(out, ref, atol=3e-2, rtol=3e-2), "mismatch vs reference"

    # TODO(synk): fap=True branch (separate 5-token key/value prefix) not implemented;
    # the default constructor (fap=False) path is what this kernel reproduces.
    print("KERNEL_OK")
</pallas_src>

<mosaic_0001>
module attributes {stable_mosaic.version = 11 : i64} {
  func.func @_class_attn_kernel(%arg0: i32, %arg1: memref<8x8x32xf32, #tpu.memory_space<vmem>>, %arg2: memref<32x256xbf16, #tpu.memory_space<vmem>>, %arg3: memref<32x8xbf16, #tpu.memory_space<vmem>>, %arg4: memref<8x32xbf16, #tpu.memory_space<vmem>>, %arg5: memref<1x32xf32, #tpu.memory_space<vmem>>, %arg6: memref<8x8xbf16, #tpu.memory_space<vmem>>, %arg7: memref<8x32xf32, #tpu.memory_space<vmem>>) attributes {dimension_semantics = [#tpu.dimension_semantics<parallel>], iteration_bounds = array<i64: 2>, scalar_prefetch = 0 : i64, scratch_operands = 0 : i64, tpu.core_type = #tpu.core_type<tc>, window_params = [{transform_indices = @transform_0, window_bounds = array<i64: 8, 8, 32>}, {pipeline_mode = #tpu.pipeline_mode<synchronous>, transform_indices = @transform_1, window_bounds = array<i64: 32, 256>}, {pipeline_mode = #tpu.pipeline_mode<synchronous>, transform_indices = @transform_2, window_bounds = array<i64: 32, 8>}, {pipeline_mode = #tpu.pipeline_mode<synchronous>, transform_indices = @transform_3, window_bounds = array<i64: 8, 32>}, {pipeline_mode = #tpu.pipeline_mode<synchronous>, transform_indices = @transform_4, window_bounds = array<i64: 1, 32>}, {pipeline_mode = #tpu.pipeline_mode<synchronous>, transform_indices = @transform_5, window_bounds = array<i64: 8, 8>}, {transform_indices = @transform_6, window_bounds = array<i64: 8, 32>}]} {
    %c0 = arith.constant 0 : index
    %c0_0 = arith.constant 0 : index
    %c0_1 = arith.constant 0 : index
    %0 = vector.load %arg1[%c0, %c0_0, %c0_1] : memref<8x8x32xf32, #tpu.memory_space<vmem>>, vector<8x8x32xf32>
    %1 = arith.truncf %0 : vector<8x8x32xf32> to vector<8x8x32xbf16>
    %2 = vector.shape_cast %1 : vector<8x8x32xbf16> to vector<64x32xbf16>
    %3 = vector.extract_strided_slice %1 {offsets = [0, 0, 0], sizes = [8, 1, 32], strides = [1, 1, 1]} : vector<8x8x32xbf16> to vector<8x1x32xbf16>
    %4 = vector.shape_cast %3 : vector<8x1x32xbf16> to vector<8x32xbf16>
    %c0_2 = arith.constant 0 : index
    %c0_3 = arith.constant 0 : index
    %5 = vector.load %arg2[%c0_2, %c0_3] : memref<32x256xbf16, #tpu.memory_space<vmem>>, vector<32x256xbf16>
    %cst = arith.constant dense<0.000000e+00> : vector<64x256xf32>
    %6 = tpu.matmul %2, %5, %cst {dimension_numbers = #tpu.dot_dimension_numbers<[1], [0], [0], [1], [0, 0, 1, 1], [], []>} : vector<64x32xbf16>, vector<32x256xbf16>, vector<64x256xf32> -> vector<64x256xf32>
    %7 = vector.extract_strided_slice %6 {offsets = [0, 0], sizes = [64, 8], strides = [1, 1]} : vector<64x256xf32> to vector<64x8xf32>
    %8 = vector.shape_cast %7 : vector<64x8xf32> to vector<8x8x8xf32>
    %9 = vector.extract_strided_slice %6 {offsets = [0, 128], sizes = [64, 8], strides = [1, 1]} : vector<64x256xf32> to vector<64x8xf32>
    %10 = vector.shape_cast %9 : vector<64x8xf32> to vector<8x8x8xf32>
    %c0_4 = arith.constant 0 : index
    %c0_5 = arith.constant 0 : index
    %11 = vector.load %arg3[%c0_4, %c0_5] : memref<32x8xbf16, #tpu.memory_space<vmem>>, vector<32x8xbf16>
    %cst_6 = arith.constant dense<0.000000e+00> : vector<8x8xf32>
    %12 = tpu.matmul %4, %11, %cst_6 {dimension_numbers = #tpu.dot_dimension_numbers<[1], [0], [0], [1], [0, 0, 1, 1], [], []>} : vector<8x32xbf16>, vector<32x8xbf16>, vector<8x8xf32> -> vector<8x8xf32>
    %cst_7 = arith.constant 0.707106769 : f32
    %13 = vector.broadcast %cst_7 : f32 to vector<8x8xf32>
    %14 = arith.mulf %12, %13 : vector<8x8xf32>
    %15 = vector.shape_cast %14 : vector<8x8xf32> to vector<8x1x8xf32>
    %16 = vector.broadcast %15 : vector<8x1x8xf32> to vector<8x8x8xf32>
    %17 = arith.mulf %16, %8 : vector<8x8x8xf32>
    %18 = arith.truncf %17 : vector<8x8x8xf32> to vector<8x8x8xbf16>
    %19 = vector.shape_cast %18 : vector<8x8x8xbf16> to vector<64x8xbf16>
    %c0_8 = arith.constant 0 : index
    %c0_9 = arith.constant 0 : index
    %20 = vector.load %arg6[%c0_8, %c0_9] : memref<8x8xbf16, #tpu.memory_space<vmem>>, vector<8x8xbf16>
    %cst_10 = arith.constant dense<0.000000e+00> : vector<64x8xf32>
    %21 = tpu.matmul %19, %20, %cst_10 {dimension_numbers = #tpu.dot_dimension_numbers<[1], [0], [0], [1], [0, 0, 1, 1], [], []>} : vector<64x8xbf16>, vector<8x8xbf16>, vector<64x8xf32> -> vector<64x8xf32>
    %22 = vector.shape_cast %21 : vector<64x8xf32> to vector<8x8x8xf32>
    %cst_11 = arith.constant dense<0xFF800000> : vector<8x8xf32>
    %23 = vector.multi_reduction <maximumf>, %22, %cst_11 [1] : vector<8x8x8xf32> to vector<8x8xf32>
    %24 = vector.shape_cast %23 : vector<8x8xf32> to vector<8x1x8xf32>
    %25 = vector.broadcast %24 : vector<8x1x8xf32> to vector<8x8x8xf32>
    %26 = arith.subf %22, %25 : vector<8x8x8xf32>
    %27 = math.exp %26 : vector<8x8x8xf32>
    %cst_12 = arith.constant dense<0.000000e+00> : vector<8x8xf32>
    %28 = vector.multi_reduction <add>, %27, %cst_12 [1] : vector<8x8x8xf32> to vector<8x8xf32>
    %29 = arith.mulf %27, %10 : vector<8x8x8xf32>
    %cst_13 = arith.constant dense<0.000000e+00> : vector<8x8xf32>
    %30 = vector.multi_reduction <add>, %29, %cst_13 [1] : vector<8x8x8xf32> to vector<8x8xf32>
    %31 = tpu.reciprocal %28 {approx = true} : vector<8x8xf32> -> vector<8x8xf32>
    %32 = arith.mulf %30, %31 : vector<8x8xf32>
    %33 = arith.truncf %32 : vector<8x8xf32> to vector<8x8xbf16>
    %c0_14 = arith.constant 0 : index
    %c0_15 = arith.constant 0 : index
    %34 = vector.load %arg4[%c0_14, %c0_15] : memref<8x32xbf16, #tpu.memory_space<vmem>>, vector<8x32xbf16>
    %cst_16 = arith.constant dense<0.000000e+00> : vector<8x32xf32>
    %35 = tpu.matmul %33, %34, %cst_16 {dimension_numbers = #tpu.dot_dimension_numbers<[1], [0], [0], [1], [0, 0, 1, 1], [], []>} : vector<8x8xbf16>, vector<8x32xbf16>, vector<8x32xf32> -> vector<8x32xf32>
    %c0_17 = arith.constant 0 : index
    %c0_18 = arith.constant 0 : index
    %36 = vector.load %arg5[%c0_17, %c0_18] : memref<1x32xf32, #tpu.memory_space<vmem>>, vector<1x32xf32>
    %37 = vector.broadcast %36 : vector<1x32xf32> to vector<8x32xf32>
    %38 = arith.addf %35, %37 : vector<8x32xf32>
    %c0_19 = arith.constant 0 : index
    %c0_20 = arith.constant 0 : index
    %39 = vector.load %arg7[%c0_19, %c0_20] : memref<8x32xf32, #tpu.memory_space<vmem>>, vector<8x32xf32>
    tpu.vector_store %arg7[%c0_19, %c0_20], %38 {strides = array<i32>} : memref<8x32xf32, #tpu.memory_space<vmem>>, vector<8x32xf32>,
    return
  }
  func.func @transform_0(%arg0: i32) -> (i32, i32, i32) {
    %c0_i32 = arith.constant 0 : i32
    %c0_i32_0 = arith.constant 0 : i32
    %c0_i32_1 = arith.constant 0 : i32
    return %arg0, %c0_i32, %c0_i32_0 : i32, i32, i32
  }
  func.func @transform_1(%arg0: i32) -> (i32, i32) {
    %c0_i32 = arith.constant 0 : i32
    %c0_i32_0 = arith.constant 0 : i32
    %c0_i32_1 = arith.constant 0 : i32
    return %c0_i32, %c0_i32_0 : i32, i32
  }
  func.func @transform_2(%arg0: i32) -> (i32, i32) {
    %c0_i32 = arith.constant 0 : i32
    %c0_i32_0 = arith.constant 0 : i32
    %c0_i32_1 = arith.constant 0 : i32
    return %c0_i32, %c0_i32_0 : i32, i32
  }
  func.func @transform_3(%arg0: i32) -> (i32, i32) {
    %c0_i32 = arith.constant 0 : i32
    %c0_i32_0 = arith.constant 0 : i32
    %c0_i32_1 = arith.constant 0 : i32
    return %c0_i32, %c0_i32_0 : i32, i32
  }
  func.func @transform_4(%arg0: i32) -> (i32, i32) {
    %c0_i32 = arith.constant 0 : i32
    %c0_i32_0 = arith.constant 0 : i32
    %c0_i32_1 = arith.constant 0 : i32
    return %c0_i32, %c0_i32_0 : i32, i32
  }
  func.func @transform_5(%arg0: i32) -> (i32, i32) {
    %c0_i32 = arith.constant 0 : i32
    %c0_i32_0 = arith.constant 0 : i32
    %c0_i32_1 = arith.constant 0 : i32
    return %c0_i32, %c0_i32_0 : i32, i32
  }
  func.func @transform_6(%arg0: i32) -> (i32, i32) {
    %c0_i32 = arith.constant 0 : i32
    %c0_i32_0 = arith.constant 0 : i32
    return %arg0, %c0_i32 : i32, i32
  }
}

</mosaic_0001>

<bundles_post_ra>
// kernel: tpu_custom_call.1
= control target key start
LH: loop header
LB: loop body
LE: loop exit
PB: predicated region body
PF: predicated region fallthrough
CT: control target
= control target key end

     0   :  { %11 = vsyncpa [#allocation3], 0  ;;  %s1804_s0 = inlined_call_operand.hbm [shape: f32[16,8,32], index: 0, kind: input, shape index: {}]   ;;  %s1805_s1 = inlined_call_operand.hbm [shape: bf16[32,256], index: 1, kind: input, shape index: {}]   ;;  %s1806_s2 = inlined_call_operand.vmem [shape: bf16[32,8], index: 2, kind: input, shape index: {}]   ;;  %s1807_s3 = inlined_call_operand.vmem [shape: bf16[8,32], index: 3, kind: input, shape index: {}]   ;;  %s1808_s4 = inlined_call_operand.vmem [shape: f32[1,32], index: 4, kind: input, shape index: {}]   ;;  %s1809_s5 = inlined_call_operand.vmem [shape: bf16[8,8], index: 5, kind: input, shape index: {}]   ;;  %s1810_s6 = inlined_call_operand.hbm [shape: f32[16,32], index: 6, kind: output, shape index: {}]  }
   0x1   :  { %13 = vsyncpa [#allocation3 + $0x1], 0 }
   0x2   :  { %14 = vsyncpa [#allocation6], 0 }
   0x3   :  { %15 = vsyncpa [#allocation4], 0 }
   0x4   :  { %17 = vsyncpa [#allocation4 + $0x1], 0  ;;  %s1482_s21 = smov 0   ;;  %s1484_s22 = smov 0  }
   0x5   :  { %s1486_s23 = smov 0   ;;  %s1488_s24 = smov 0  }
   0x6 LB: > { %s1503_s25 = sadd.s32 4294967295, %s1436_s24   ;;  %s1121_s26 = sadd.s32 4294967294, %s1436_s24   ;;  %s1436_s24 = sphi %s1488_s24, %s1830_s24   ;;  %s1432_s23 = sphi %s1486_s23, %s1829_s23   ;;  %s1428_s22 = sphi %s1484_s22, %s1828_s22   ;;  %s1424_s21 = sphi %s1482_s21, %s1827_s21  }
   0x7   : > { %p43_p0 = scmp.ne.s32.totalorder %s1428_s22, %s1424_s21  ;;  %p1811_p1 = scmp.eq.s32.totalorder %s1503_s25, 0 }
   0x8   : > { %p178_p3 = scmp.eq.s32.totalorder %s1121_s26, 1  ;;  %p1122_p5 = scmp.ge.s32.totalorder %s1436_s24, 1 }
   0x9   : > { %p1512_p4 = por %p1811_p1, %p43_p0  ;;  %p185_p7 = scmp.lt.s32.totalorder %s1436_s24, 3 }
   0xa   : > { %p1517_p6 = por %p178_p3, %p43_p0  ;;  %s1438_s30 = smov [#allocation5]  }
   0xb   : > { %s1814_s27 = scalar_select %p1512_p4, 1, 0 }
   0xc   : > { %s1815_s28 = scalar_select %p1517_p6, 1, 0 }
   0xd   : > { %p1522_p8 = pnand %p1122_p5, %p185_p7  ;;  %s197_s7 = sshll.u32 %s1438_s30, 4  ;;  %s1526_s7 = int_to_ptr.vmem [resolvable:$true] %s197_s7 }
   0xe   : > { %s1538_s9 = sadd.s32 1, %s1436_s24   ;;  %s30_s10 = sadd.s32 1, %s1432_s23 }
   0xf   : > { %s1816_s29 = scalar_select %p1522_p8, 1, 0 }
  0x10   : > { %p1213_p9 = pneg %p1522_p8  ;;  %s27_s11 = ssub.s32 %s1436_s24, %s1538_s9 }
  0x11   : > { %s1308_s14 = scalar_lea.hbm %s1805_s1, 512 }
  0x12   : > { %p1533_p11 = pnand %p1213_p9, %p1811_p1  ;;  %p1309_p12 = scmp.ne.s32.totalorder %s1805_s1, %s1308_s14 }
  0x13   : > { %p1315_p5 = scmp.lt.u32.totalorder %s1308_s14, %s1805_s1 }
  0x14   : > { %p1310_p13 = pneg %p1533_p11 }
  0x16   : > { %p1311_p0 = pnand %p1310_p13, %p1309_p12 }
  0x18   : > { %p1312_p3 = pneg %p1311_p0 }
  0x1a   : > { %p1317_p7 = pnand %p1315_p5, %p1312_p3 }
  0x1c   : > { %1320 = shalt.err (!%p1317_p7)
}
  0x1d   : > { %s1321_s19 = scalar_lea.vmem %s1526_s7, 512  ;;  %p1329_p2 = scmp.lt.s32.totalorder %s1526_s7, %s1526_s7 }
  0x1e   : > { %p1322_p9 = scmp.ne.s32.totalorder %s1526_s7, %s1321_s19  ;;  %p1330_p6 = scmp.lt.s32.totalorder %s1321_s19, %s1321_s19 }
  0x20   : > { %p1324_p10 = pnand %p1322_p9, %p1310_p13  ;;  %p1331_p4 = por %p1330_p6, %p1329_p2 }
  0x22   : > { %p1325_p1 = pneg %p1324_p10 }
  0x24   : > { %p1332_p8 = pnand %p1331_p4, %p1325_p1 }
  0x26   : > { %1335 = shalt.err (!%p1332_p8)
}
  0x27   : > { %s1439_s20 = smov 128   ;;  %s1440_s26 = smov 8  }
  0x28   : > { %1216 = dma.hbm_to_vmem [thread:$0]  (!%p1533_p11), %s1805_s1, 512, %s1526_s7, [#allocation6], %s1439_s20, %s1439_s20, %s1440_s26  }
  0x29   : > { %p28_p1 = scmp.eq.s32.totalorder %s27_s11, 0  ;;  %p37_p2 = scmp.ne.s32.totalorder %s1432_s23, %s1428_s22 }
  0x2a   : > { %p38_p4 = scmp.eq.s32.totalorder %s1436_s24, 0  ;;  %p1226_p6 = scmp.lt.s32.totalorder %s1436_s24, 2 }
  0x2b   : > { %s1572_s13 = scalar_select %p28_p1, %s1432_s23, %s30_s10  }
  0x2c   : > { %p39_p8 = por %p38_p4, %p37_p2  ;;  %p1818_p10 = scmp.eq.s32.totalorder %s1503_s25, 1 }
  0x2d   : > { %s223_s8 = sand.u32 1, %s1432_s23   ;;  %s1161_s15 = sshll.u32 %s1436_s24, 10 }
  0x2e   : > { %p1576_p12 = por %p1818_p10, %p37_p2  ;;  %s1125_s16 = sshll.u32 %s223_s8, 6 }
  0x2f   : > { %s1585_s19 = scalar_lea.hbm %s1804_s0, %s1161_s15  ;;  %s227_s7 = scalar_lea.vmem [#allocation2], %s1125_s16 }
  0x30   : > { %s234_s10 = sshll.u32 %s227_s7, 4  ;;  %p1587_p11 = pnand %p1226_p6, %p39_p8  ;;  %s1591_s10 = int_to_ptr.vmem [resolvable:$true] %s234_s10 }
  0x31   : > { %s1593_s30 = scalar_lea.sflag [#allocation3], %s223_s8  ;;  %s1336_s12 = scalar_lea.hbm %s1585_s19, 1024 }
  0x32   : > { %p1337_p13 = scmp.ne.s32.totalorder %s1585_s19, %s1336_s12  ;;  %p1338_p0 = pneg %p1587_p11 }
  0x33   : > { %s1341_s17 = scalar_lea.hbm %s1804_s0, 2048  ;;  %p1342_p7 = scmp.lt.u32.totalorder %s1585_s19, %s1804_s0 }
  0x34   : > { %p1339_p3 = pnand %p1338_p0, %p1337_p13  ;;  %p1343_p9 = scmp.lt.u32.totalorder %s1341_s17, %s1336_s12 }
  0x35   : > { %p1345_p2 = scmp.lt.u32.totalorder %s1336_s12, %s1585_s19 }
  0x36   : > { %p1340_p5 = pneg %p1339_p3  ;;  %p1344_p1 = por %p1343_p9, %p1342_p7 }
  0x38   : > { %p1346_p4 = por %p1345_p2, %p1344_p1 }
  0x3a   : > { %p1347_p6 = pnand %p1346_p4, %p1340_p5 }
  0x3c   : > { %1350 = shalt.err (!%p1347_p6)
}
  0x3d   : > { %s1351_s8 = scalar_lea.vmem %s1591_s10, 1024  ;;  %s1441_s15 = smov [#allocation2]  }
  0x3e   : > { %p1352_p8 = scmp.ne.s32.totalorder %s1591_s10, %s1351_s8  ;;  %s1356_s16 = sshll.u32 %s1441_s15, 4  ;;  %s1357_s16 = int_to_ptr.vmem [resolvable:$false] %s1356_s16 }
  0x3f   : > { %s1358_s18 = scalar_lea.vmem %s1357_s16, 2048  ;;  %p1359_p3 = scmp.lt.s32.totalorder %s1591_s10, %s1357_s16 }
  0x40   : > { %p1354_p10 = pnand %p1352_p8, %p1338_p0  ;;  %p1360_p7 = scmp.lt.s32.totalorder %s1358_s18, %s1351_s8 }
  0x42   : > { %p1355_p13 = pneg %p1354_p10  ;;  %p1361_p9 = por %p1360_p7, %p1359_p3 }
  0x44   : > { %p1362_p1 = pnand %p1361_p9, %p1355_p13 }
  0x46   : > { %1365 = shalt.err (!%p1362_p1)
}
  0x47   : > { %1220 = dma.hbm_to_vmem [thread:$0]  (!%p1587_p11), %s1585_s19, 1024, %s1591_s10, %s1593_s30, %s1439_s20, %s1439_s20, %s1440_s26  }
  0x48   : > { %p1821_p0 = scmp.ne.s32.totalorder %s1816_s29, 0 }
  0x49   : > { %s1627_s12 = sand.u32 (!%p1821_p0), 1, %s1428_s22   ;;  %p1822_p5 = scmp.ne.s32.totalorder (!%p1821_p0), %s1814_s27, 0 }
  0x4a   : > { %246 = sbr.rel (%p1821_p0) target bundleno = 865 (0x361), region = 44  ;;  %s1129_s17 = sshll.u32 (!%p1821_p0), %s1627_s12, 6 }
  0x4b   : > { %s249_s7 = scalar_lea.sflag (!%p1821_p0), [#allocation3], %s1627_s12  ;;  %s1631_s8 = scalar_lea.vmem (!%p1821_p0), [#allocation2], %s1129_s17 }
  0x51   : > { %1411 = dma.done.wait (%p1822_p5), %s249_s7, 1024  }
  0x52   : > { %1413 = vsyncadd (%p1822_p5), %s249_s7, 4294966272  ;;  %p1823_p11 = scmp.eq.s32.totalorder %s1503_s25, 0 }
  0x54   : > { %1415 = dma.done.wait (%p1823_p11), [#allocation6], 512   ;;  %p1824_p2 = pmov %p1823_p11 }
  0x55   : > { %v1442_v0 = vmov 0.0   ;;  %v1443_v1 = vmov 0   ;;  %vm1444_vm0 = vmmov 0   ;;  %v1268_v2 = vld [vmem:[#allocation5 + $0x4] ss:$8 sps:$4 sm:$0xff]   ;;  %v289_v9 = vld [vmem:[%s1631_s8 + $0x10] sm:$0xff]  ;;  %v520_v57 = vlaneseq }
  0x56   : > { %1417 = vsyncadd (%p1824_p2), [#allocation6], 4294966784  ;;  %1180 = vmatprep.subr.bf16.mxu1 %v1442_v0  ;;  %392 = vmatprep.mubr.bf16.mxu0 %v1443_v1  ;;  %v1270_v3 = vld [vmem:[#allocation5] ss:$8 sps:$4 sm:$0xff]   ;;  %v1271_v4 = vld [vmem:[#allocation5 + $0x14] ss:$8 sps:$4 sm:$0xff]   ;;  %v297_v12 = vpack.c.bf16 %v289_v9, %v289_v9 }
  0x57   : > { %1184 = vmatprep.mubr.msk.bf16.mxu1 %vm1444_vm0, %v1442_v0  ;;  %360 = vmatprep.subr.bf16.mxu0 %v1268_v2  ;;  %v1273_v5 = vld [vmem:[#allocation5 + $0x10] ss:$8 sps:$4 sm:$0xff]   ;;  %v1274_v6 = vld [vmem:[%s1806_s2] sm:$0xff]   ;;  %v288_v8 = vld [vmem:[%s1631_s8 + $0x8] sm:$0xff]  ;;  %vm347_vm1 = vcmask 261120   ;;  %vm438_vm2 = vcmask 1041409  }
  0x58   : > { %361 = vmatpush1.bf16.msra.mxu0 %v1270_v3  ;;  %v287_v7 = vld [vmem:[%s1631_s8] sm:$0xff]  ;;  %1181 = vmatpush3.bf16.msra.mxu1 %v1274_v6  ;;  %v296_v11 = vpack.c.bf16 %v288_v8, %v288_v8  ;;  %v1275_v13 = vld [vmem:[%s1806_s2 + $0x8] sm:$0xff]   ;;  %v290_v14 = vld [vmem:[%s1631_s8 + $0x18] sm:$0xff]  ;;  %v317_v22 = vunpack.c.l.b16 %v297_v12  ;;  %vm441_vm3 = vcmask 1042434   ;;  %vm444_vm4 = vcmask 1043459   ;;  %s1131_s15 = sshll.u32 %s1627_s12, 3 }
  0x59   : > { %362 = vmatprep.subr.bf16.mxu0 %v1271_v4  ;;  %v295_v10 = vpack.c.bf16 %v287_v7, %v287_v7  ;;  %v1162_v16 = vpack.c.bf16 %v288_v8, %v287_v7  ;;  %1182 = vmatprep.subr.bf16.mxu1 %v1442_v0  ;;  %v291_v17 = vld [vmem:[%s1631_s8 + $0x20] sm:$0xff]  ;;  %v292_v18 = vld [vmem:[%s1631_s8 + $0x28] sm:$0xff]  ;;  %v293_v19 = vld [vmem:[%s1631_s8 + $0x30] sm:$0xff]  ;;  %v298_v20 = vpack.c.bf16 %v290_v14, %v290_v14  ;;  %vm447_vm5 = vcmask 1044484   ;;  %s1158_s17 = sshll.u32 %s1503_s25, 7  ;;  %s284_s7 = scalar_lea.vmem [#allocation7], %s1131_s15 }
  0x5a   : > { %v316_v21 = vunpack.c.l.b16 %v296_v11  ;;  %v294_v23 = vld [vmem:[%s1631_s8 + $0x38] sm:$0xff]  ;;  %v299_v24 = vpack.c.bf16 %v291_v17, %v291_v17  ;;  %v300_v25 = vpack.c.bf16 %v292_v18, %v292_v18  ;;  %v301_v26 = vpack.c.bf16 %v293_v19, %v293_v19  ;;  %v621_v51 = vld [vmem:[%s1809_s5] sm:$0xf]  ;;  %s1041_s8 = sshll.u32 %s284_s7, 4  ;;  %s1759_s20 = scalar_lea.hbm %s1810_s6, %s1158_s17  ;;  %s1761_s8 = int_to_ptr.vmem [resolvable:$true] %s1041_s8 }
  0x5b   : > { %v315_v15 = vunpack.c.l.b16 %v295_v10  ;;  %v302_v27 = vpack.c.bf16 %v294_v23, %v294_v23  ;;  %v318_v28 = vunpack.c.l.b16 %v298_v20  ;;  %v440_v30 = vrot.slane %v317_v22, 6  ;;  %s1028_s25 = scalar_lea.sflag [#allocation4], %s1627_s12  ;;  %s1366_s26 = scalar_lea.vmem %s1761_s8, 128 }
  0x5c   : > { %363 = vmatpush1.bf16.msra.mxu0 %v1273_v5  ;;  %v437_v29 = vrot.slane %v316_v21, 7  ;;  %1183 = vmatpush3.bf16.msra.mxu1 %v1275_v13  ;;  %v319_v31 = vunpack.c.l.b16 %v299_v24  ;;  %v320_v32 = vunpack.c.l.b16 %v300_v25  ;;  %v321_v33 = vunpack.c.l.b16 %v301_v26  ;;  %p1367_p4 = scmp.ne.s32.totalorder %s1761_s8, %s1366_s26  ;;  %s1446_s19 = smov [#allocation7]  }
  0x5d   : > { %v322_v34 = vunpack.c.l.b16 %v302_v27  ;;  %v443_v35 = vrot.slane %v318_v28, 5  ;;  %vm450_vm6 = vcmask 1045509   ;;  %vm453_vm7 = vcmask 1046534   ;;  %s1370_s10 = sshll.u32 %s1446_s19, 4  ;;  %s1371_s10 = int_to_ptr.vmem [resolvable:$false] %s1370_s10 }
  0x5e   : > { %v439_v36 = vsel %vm438_vm2, %v437_v29, %v315_v15  ;;  %v446_v37 = vrot.slane %v319_v31, 4  ;;  %v449_v38 = vrot.slane %v320_v32, 3  ;;  %v452_v40 = vrot.slane %v321_v33, 2  ;;  %p1368_p6 = pnand %p1367_p4, %p1576_p12  ;;  %s1372_s11 = scalar_lea.vmem %s1371_s10, 256 }
  0x5f   : > { %1140 = vmatmul.mubr.msk.bf16.vlgmr.msra.gmra.mrb[0].mxu0 %vm347_vm1, %v1162_v16  ;;  %v442_v39 = vsel %vm441_vm3, %v440_v30, %v439_v36  ;;  %v455_v42 = vrot.slane %v322_v34, 1  ;;  %vm456_vm8 = vcmask 1047559   ;;  %v1163_v44 = vpack.c.bf16 %v290_v14, %v289_v9  ;;  %p1373_p10 = scmp.lt.s32.totalorder %s1761_s8, %s1371_s10  ;;  %p1374_p13 = scmp.lt.s32.totalorder %s1372_s11, %s1366_s26 }
  0x60   : > { %402 = vmatprep.mubr.bf16.mxu0 %v1443_v1  ;;  %v445_v41 = vsel %vm444_vm4, %v443_v35, %v442_v39  ;;  %v1164_v49 = vpack.c.bf16 %v292_v18, %v291_v17  ;;  %v1165_v50 = vpack.c.bf16 %v294_v23, %v293_v19  ;;  %vm655_vm9 = vcmask 1043456   ;;  %p1369_p8 = pneg %p1368_p6 }
  0x61   : > { %v448_v43 = vsel %vm447_vm5, %v446_v37, %v445_v41  ;;  %1204 = vmatprep.subr.msk.bf16.mxu1 %vm655_vm9, %v621_v51  ;;  %v657_v52 = vsel %vm655_vm9, %v621_v51, 0  ;;  %v1445_v55 = vmov 1966171168   ;;  %v521_v61 = vshrl.u32 %v520_v57, 7  ;;  %v948_v51 = vld [vmem:[%s1807_s3] sm:$0xf]  ;;  %p1375_p3 = por %p1374_p13, %p1373_p10 }
  0x62   : > { %v451_v45 = vsel %vm450_vm6, %v449_v38, %v448_v43  ;;  %v518_v56 = vunpack.c.l.s4 %v1445_v55  ;;  %vm642_vm10 = vcmask 64512  }
  0x63   : > { %v454_v46 = vsel %vm453_vm7, %v452_v40, %v451_v45  ;;  %v567_v10 = vsub.s32 0, %v521_v61  ;;  %p1376_p7 = pnand %p1375_p3, %p1369_p8 }
  0x64   : > { %v457_v47 = vsel %vm456_vm8, %v455_v42, %v454_v46  ;;  %v519_v60 = vunpack.c.0.s8 %v518_v56 }
  0x65   : > { %v458_v48 = vpack.c.b16 %v457_v47, %v457_v47 }
  0x66   : > { %v522_v63 = vsub.s32 %v519_v60, %v521_v61 }
  0x67   : > { %1141 = vmatmul.mubr.msk.bf16.gmra.mrb[4].mxu0 %vm347_vm1, %v1163_v44  ;;  %1185 = vmatmul.mubr.msk.bf16.vlgmr.msra.gmra.mrb[0].mxu1 %vm347_vm1, %v458_v48 }
  0x68   : > { %412 = vmatprep.mubr.bf16.mxu0 %v1443_v1  ;;  %1189 = vmatpush3.bf16.msra.mxu1 %v657_v52  ;;  %v984_v52 = vsel %vm655_vm9, %v948_v51, 0 }
  0x69   : > { %1198 = vmatprep.subr.bf16.mxu1 %v1442_v0 }
  0x6f   : > { %1142 = vmatmul.mubr.msk.bf16.gmra.mrb[8].mxu0 %vm347_vm1, %v1164_v49 }
  0x70   : > { %422 = vmatprep.mubr.bf16.mxu0 %v1443_v1 }
  0x77   : > { %1143 = vmatmul.mubr.msk.bf16.gmra.mrb[12].mxu0 %vm347_vm1, %v1165_v50 }
 0x132   : > { %v394_v53 = vpop.f32.mrb[0].mxu0 }
 0x133   : > { %v1681_v54 = vpop.f32.mrb[1].mxu0 }
 0x134   : > { %v398_v58 = vpop.f32.mrb[2].mxu0 }
 0x135   : > { %v1683_v59 = vpop.f32.mrb[3].mxu0 }
 0x13a   : > { %v404_v62 = vpop.f32.mrb[4].mxu0  ;;  %v508_v2 = vpop.f32.mrb[0].mxu1 }
 0x13b   : > { %v1685_v1 = vpop.f32.mrb[5].mxu0  ;;  %v514_v4 = vmul.f32 0.70710677, %v508_v2  ;;  %v1186_v5 = vpop.f32.mrb[1].mxu1 }
 0x13c   : > { %v408_v3 = vpop.f32.mrb[6].mxu0  ;;  %v511_v7 = vpop.f32.mrb[2].mxu1 }
 0x13d   : > { %v1687_v6 = vpop.f32.mrb[7].mxu0  ;;  %v516_v8 = vcombine.high %v514_v4, %v514_v4  ;;  %v523_v9 = vrot.slane %v514_v4, %v522_v63  ;;  %v1187_v11 = vpop.f32.mrb[3].mxu1 }
 0x13f   : > { %v530_v12 = vrot.slane %v516_v8, %v522_v63  ;;  %v531_v13 = vcombine.high %v523_v9, %v523_v9  ;;  %v539_v14 = vrot.slane %v523_v9, %v522_v63 }
 0x141   : > { %v568_v16 = vrot.slane %v539_v14, %v567_v10  ;;  %v561_v17 = vcombine.high %v539_v14, %v539_v14  ;;  %v553_v18 = vrot.slane %v531_v13, %v522_v63  ;;  %v546_v19 = vrot.slane %v530_v12, %v522_v63 }
 0x142   : > { %v414_v15 = vpop.f32.mrb[8].mxu0  ;;  %v532_v22 = vcombine.high %v530_v12, %v530_v12 }
 0x143   : > { %v1689_v20 = vpop.f32.mrb[9].mxu0  ;;  %v605_v23 = vmul.f32 %v568_v16, %v394_v53  ;;  %v576_v24 = vrot.slane %v561_v17, %v567_v10  ;;  %v563_v25 = vcombine.high %v553_v18, %v553_v18  ;;  %v572_v26 = vrot.slane %v553_v18, %v567_v10 }
 0x144   : > { %v418_v21 = vpop.f32.mrb[10].mxu0  ;;  %v584_v28 = vrot.slane %v546_v19, %v567_v10  ;;  %v560_v29 = vrot.slane %v532_v22, %v522_v63  ;;  %v562_v30 = vcombine.high %v546_v19, %v546_v19 }
 0x145   : > { %v1691_v27 = vpop.f32.mrb[11].mxu0  ;;  %v607_v31 = vmul.f32 %v576_v24, %v404_v62  ;;  %v580_v32 = vrot.slane %v563_v25, %v567_v10  ;;  %v606_v33 = vmul.f32 %v572_v26, %v398_v58 }
 0x146   : > { %v609_v34 = vmul.f32 %v584_v28, %v414_v15  ;;  %v588_v35 = vrot.slane %v560_v29, %v567_v10  ;;  %v564_v36 = vcombine.high %v560_v29, %v560_v29  ;;  %v592_v39 = vrot.slane %v562_v30, %v567_v10 }
 0x147   : > { %v608_v37 = vmul.f32 %v580_v32, %v408_v3  ;;  %v1166_v38 = vpack.c.bf16 %v606_v33, %v605_v23 }
 0x148   : > { %v610_v40 = vmul.f32 %v588_v35, %v418_v21  ;;  %v596_v45 = vrot.slane %v564_v36, %v567_v10 }
 0x149   : > { %v1167_v42 = vpack.c.bf16 %v608_v37, %v607_v31  ;;  %1190 = vmatprep.mubr.msk.bf16.mxu1 %vm642_vm10, %v1166_v38 }
 0x14a   : > { %v424_v41 = vpop.f32.mrb[12].mxu0  ;;  %v1168_v46 = vpack.c.bf16 %v610_v40, %v609_v34 }
 0x14b   : > { %v611_v43 = vmul.f32 %v592_v39, %v424_v41  ;;  %v1694_v44 = vpop.f32.mrb[13].mxu0  ;;  %1191 = vmatmul.mubr.msk.bf16.vlgmr.msra.gmra.mrb[4].mxu1 %vm642_vm10, %v1167_v42 }
 0x14c   : > { %v428_v47 = vpop.f32.mrb[14].mxu0  ;;  %1194 = vmatprep.mubr.msk.bf16.mxu1 %vm642_vm10, %v1168_v46  ;;  %1199 = vmatpush3.bf16.msra.mxu1 %v984_v52 }
 0x14d   : > { %v612_v48 = vmul.f32 %v596_v45, %v428_v47  ;;  %v1697_v49 = vpop.f32.mrb[15].mxu0 }
 0x14f   : > { %v1169_v50 = vpack.c.bf16 %v612_v48, %v611_v43 }
 0x153   : > { %1195 = vmatmul.mubr.msk.bf16.gmra.mrb[8].mxu1 %vm642_vm10, %v1169_v50 }
 0x154   : > { %1200 = vmatprep.mubr.msk.bf16.mxu1 %vm1444_vm0, %v1442_v0 }
 0x21e   : > { %v1192_v53 = vpop.f32.mrb[4].mxu1 }
 0x21f   : > { %v738_v55 = vsel %vm642_vm10, %v1192_v53, -inf  ;;  %v693_v56 = vpop.f32.mrb[5].mxu1 }
 0x220   : > { %v739_v57 = vrot.slane %v738_v55, 4  ;;  %v724_v58 = vsel %vm642_vm10, %v693_v56, -inf  ;;  %v1193_v60 = vpop.f32.mrb[6].mxu1 }
 0x221   : > { %v725_v61 = vrot.slane %v724_v58, 4  ;;  %v745_v62 = vsel %vm642_vm10, %v1193_v60, -inf  ;;  %v696_v63 = vpop.f32.mrb[7].mxu1 }
 0x222   : > { %v740_v0 = vmax.f32 %v738_v55, %v739_v57  ;;  %v746_v2 = vrot.slane %v745_v62, 4  ;;  %v731_v3 = vsel %vm642_vm10, %v696_v63, -inf }
 0x223   : > { %v726_v4 = vmax.f32 %v724_v58, %v725_v61  ;;  %v732_v5 = vrot.slane %v731_v3, 4 }
 0x224   : > { %v741_v7 = vrot.slane %v740_v0, 2  ;;  %v747_v8 = vmax.f32 %v745_v62, %v746_v2 }
 0x225   : > { %v727_v9 = vrot.slane %v726_v4, 2  ;;  %v733_v10 = vmax.f32 %v731_v3, %v732_v5 }
 0x226   : > { %v742_v11 = vmax.f32 %v740_v0, %v741_v7  ;;  %v748_v12 = vrot.slane %v747_v8, 2  ;;  %v1196_v13 = vpop.f32.mrb[8].mxu1 }
 0x227   : > { %v728_v14 = vmax.f32 %v726_v4, %v727_v9  ;;  %v734_v15 = vrot.slane %v733_v10, 2  ;;  %v766_v16 = vsel %vm642_vm10, %v1196_v13, -inf  ;;  %v709_v17 = vpop.f32.mrb[9].mxu1 }
 0x228   : > { %v743_v18 = vrot.slane %v742_v11, 1  ;;  %v749_v19 = vmax.f32 %v747_v8, %v748_v12  ;;  %v767_v21 = vrot.slane %v766_v16, 4  ;;  %v752_v22 = vsel %vm642_vm10, %v709_v17, -inf  ;;  %v1197_v23 = vpop.f32.mrb[10].mxu1 }
 0x229   : > { %v729_v24 = vrot.slane %v728_v14, 1  ;;  %v735_v25 = vmax.f32 %v733_v10, %v734_v15  ;;  %v753_v26 = vrot.slane %v752_v22, 4  ;;  %v773_v28 = vsel %vm642_vm10, %v1197_v23, -inf  ;;  %v1714_v29 = vpop.f32.mrb[11].mxu1 }
 0x22a   : > { %v744_v30 = vmax.f32 %v742_v11, %v743_v18  ;;  %v750_v31 = vrot.slane %v749_v19, 1  ;;  %v768_v32 = vmax.f32 %v766_v16, %v767_v21  ;;  %v774_v33 = vrot.slane %v773_v28, 4 }
 0x22b   : > { %v730_v34 = vmax.f32 %v728_v14, %v729_v24  ;;  %v736_v35 = vrot.slane %v735_v25, 1  ;;  %v754_v36 = vmax.f32 %v752_v22, %v753_v26  ;;  %v759_v37 = vsel %vm642_vm10, %v1714_v29, -inf }
 0x22c   : > { %v782_v38 = vsub.f32 %v1192_v53, %v744_v30  ;;  %v751_v39 = vmax.f32 %v749_v19, %v750_v31  ;;  %v769_v40 = vrot.slane %v768_v32, 2  ;;  %v775_v41 = vmax.f32 %v773_v28, %v774_v33 }
 0x22d   : > { %v780_v42 = vsub.f32 %v693_v56, %v730_v34  ;;  %v737_v43 = vmax.f32 %v735_v25, %v736_v35  ;;  %v755_v45 = vrot.slane %v754_v36, 2  ;;  %v760_v46 = vrot.slane %v759_v37, 4 }
 0x22e   : > { %v792_v47 = vmul.f32 1.442695, %v782_v38  ;;  %v783_v48 = vsub.f32 %v1193_v60, %v751_v39  ;;  %v770_v50 = vmax.f32 %v768_v32, %v769_v40  ;;  %v776_v51 = vrot.slane %v775_v41, 2 }
 0x22f   : > { %v788_v52 = vmul.f32 1.442695, %v780_v42  ;;  %v781_v55 = vsub.f32 %v696_v63, %v737_v43  ;;  %v756_v57 = vmax.f32 %v754_v36, %v755_v45  ;;  %v761_v58 = vmax.f32 %v759_v37, %v760_v46 }
 0x230   : > { %1276 = vpow2.f32 %v792_v47  ;;  %v794_v61 = vmul.f32 1.442695, %v783_v48  ;;  %v771_v62 = vrot.slane %v770_v50, 1  ;;  %v777_v0 = vmax.f32 %v775_v41, %v776_v51 }
 0x231   : > { %1278 = vpow2.f32 %v788_v52  ;;  %v790_v53 = vmul.f32 1.442695, %v781_v55  ;;  %v757_v2 = vrot.slane %v756_v57, 1  ;;  %v762_v3 = vrot.slane %v761_v58, 2 }
 0x232   : > { %1280 = vpow2.f32 %v794_v61  ;;  %v772_v56 = vmax.f32 %v770_v50, %v771_v62  ;;  %v778_v4 = vrot.slane %v777_v0, 1 }
 0x233   : > { %1282 = vpow2.f32 %v790_v53  ;;  %v758_v5 = vmax.f32 %v756_v57, %v757_v2  ;;  %v763_v60 = vmax.f32 %v761_v58, %v762_v3 }
 0x234   : > { %v786_v7 = vsub.f32 %v1196_v13, %v772_v56  ;;  %v779_v8 = vmax.f32 %v777_v0, %v778_v4 }
 0x235   : > { %v784_v9 = vsub.f32 %v709_v17, %v758_v5  ;;  %v764_v12 = vrot.slane %v763_v60, 1 }
 0x236   : > { %v800_v63 = vmul.f32 1.442695, %v786_v7  ;;  %v787_v10 = vsub.f32 %v1197_v23, %v779_v8 }
 0x237   : > { %v796_v11 = vmul.f32 1.442695, %v784_v9  ;;  %v765_v21 = vmax.f32 %v763_v60, %v764_v12 }
 0x238   : > { %v802_v14 = vmul.f32 1.442695, %v787_v10  ;;  %1284 = vpow2.f32 %v800_v63 }
 0x239   : > { %1286 = vpow2.f32 %v796_v11  ;;  %v785_v62 = vsub.f32 %v1714_v29, %v765_v21 }
 0x23a   : > { %v1277_v15 = vpop.eup %1276  ;;  %1288 = vpow2.f32 %v802_v14 }
 0x23b   : > { %v1279_v16 = vpop.eup %1278  ;;  %v818_v18 = vsel %vm642_vm10, %v1277_v15, 0.0  ;;  %v862_v19 = vmul.f32 %v1277_v15, %v1685_v1  ;;  %v798_v11 = vmul.f32 1.442695, %v785_v62 }
 0x23c   : > { %v1281_v22 = vpop.eup %1280  ;;  %v819_v24 = vrot.slane %v818_v18, 4  ;;  %v804_v13 = vsel %vm642_vm10, %v1279_v16, 0.0  ;;  %v860_v17 = vmul.f32 %v1279_v16, %v1681_v54 }
 0x23d   : > { %v1283_v23 = vpop.eup %1282  ;;  %v882_v25 = vsel %vm642_vm10, %v862_v19, 0.0  ;;  %v805_v26 = vrot.slane %v804_v13, 4  ;;  %v825_v28 = vsel %vm642_vm10, %v1281_v22, 0.0  ;;  %v863_v30 = vmul.f32 %v1281_v22, %v1687_v6 }
 0x23e   : > { %v820_v31 = vadd.f32 %v819_v24, %v818_v18  ;;  %v883_v32 = vrot.slane %v882_v25, 4  ;;  %v868_v1 = vsel %vm642_vm10, %v860_v17, 0.0  ;;  %v826_v33 = vrot.slane %v825_v28, 4 }
 0x23f   : > { %v806_v34 = vadd.f32 %v805_v26, %v804_v13  ;;  %v869_v35 = vrot.slane %v868_v1, 4  ;;  %v889_v36 = vsel %vm642_vm10, %v863_v30, 0.0  ;;  %v811_v54 = vsel %vm642_vm10, %v1283_v23, 0.0 }
 0x240   : > { %v821_v37 = vrot.slane %v820_v31, 2  ;;  %v884_v38 = vadd.f32 %v883_v32, %v882_v25  ;;  %v827_v39 = vadd.f32 %v826_v33, %v825_v28  ;;  %v890_v40 = vrot.slane %v889_v36, 4 }
 0x241   : > { %v807_v41 = vrot.slane %v806_v34, 2  ;;  %v870_v42 = vadd.f32 %v869_v35, %v868_v1  ;;  %v812_v43 = vrot.slane %v811_v54, 4  ;;  %v861_v6 = vmul.f32 %v1283_v23, %v1683_v59 }
 0x242   : > { %v822_v45 = vadd.f32 %v821_v37, %v820_v31  ;;  %v885_v46 = vrot.slane %v884_v38, 2  ;;  %v828_v47 = vrot.slane %v827_v39, 2  ;;  %v891_v48 = vadd.f32 %v890_v40, %v889_v36  ;;  %v1285_v57 = vpop.eup %1284 }
 0x243   : > { %v808_v50 = vadd.f32 %v807_v41, %v806_v34  ;;  %v871_v51 = vrot.slane %v870_v42, 2  ;;  %v813_v52 = vadd.f32 %v812_v43, %v811_v54  ;;  %v875_v55 = vsel %vm642_vm10, %v861_v6, 0.0  ;;  %v1287_v0 = vpop.eup %1286 }
 0x244   : > { %v823_v58 = vrot.slane %v822_v45, 1  ;;  %v829_v61 = vadd.f32 %v828_v47, %v827_v39  ;;  %v886_v53 = vadd.f32 %v885_v46, %v884_v38  ;;  %v876_v56 = vrot.slane %v875_v55, 4  ;;  %v1289_v59 = vpop.eup %1288 }
 0x245   : > { %v809_v2 = vrot.slane %v808_v50, 1  ;;  %v814_v3 = vrot.slane %v813_v52, 2  ;;  %v892_v60 = vrot.slane %v891_v48, 2  ;;  %v872_v8 = vadd.f32 %v871_v51, %v870_v42 }
 0x246   : > { %v824_v4 = vadd.f32 %v823_v58, %v822_v45  ;;  %v830_v5 = vrot.slane %v829_v61, 1  ;;  %v877_v63 = vadd.f32 %v876_v56, %v875_v55  ;;  %v887_v12 = vrot.slane %v886_v53, 1 }
 0x247   : > { %v810_v7 = vadd.f32 %v809_v2, %v808_v50  ;;  %v815_v9 = vadd.f32 %v814_v3, %v813_v52  ;;  %v893_v15 = vadd.f32 %v892_v60, %v891_v48  ;;  %v846_v16 = vsel %vm642_vm10, %v1285_v57, 0.0 }
 0x248   : > { %1290 = vrcp.f32 %v824_v4  ;;  %v831_v10 = vadd.f32 %v830_v5, %v829_v61  ;;  %v878_v29 = vrot.slane %v877_v63, 2  ;;  %v866_v18 = vmul.f32 %v1285_v57, %v1694_v44 }
 0x249   : > { %1292 = vrcp.f32 %v810_v7  ;;  %v816_v14 = vrot.slane %v815_v9, 1  ;;  %v873_v19 = vrot.slane %v872_v8, 1  ;;  %v847_v22 = vrot.slane %v846_v16, 4 }
 0x24a   : > { %1294 = vrcp.f32 %v831_v10  ;;  %v832_v24 = vsel %vm642_vm10, %v1287_v0, 0.0  ;;  %v910_v13 = vsel %vm642_vm10, %v866_v18, 0.0  ;;  %v864_v23 = vmul.f32 %v1287_v0, %v1689_v20 }
 0x24b   : > { %v817_v21 = vadd.f32 %v816_v14, %v815_v9  ;;  %v833_v17 = vrot.slane %v832_v24, 4  ;;  %v853_v25 = vsel %vm642_vm10, %v1289_v59, 0.0  ;;  %v879_v26 = vadd.f32 %v878_v29, %v877_v63 }
 0x24c   : > { %v848_v28 = vadd.f32 %v847_v22, %v846_v16  ;;  %v911_v30 = vrot.slane %v910_v13, 4  ;;  %v896_v32 = vsel %vm642_vm10, %v864_v23, 0.0  ;;  %v854_v44 = vrot.slane %v853_v25, 4 }
 0x24d   : > { %1296 = vrcp.f32 %v817_v21  ;;  %v834_v31 = vadd.f32 %v833_v17, %v832_v24  ;;  %v867_v1 = vmul.f32 %v1289_v59, %v1697_v49  ;;  %v894_v33 = vrot.slane %v893_v15, 1 }
 0x24e   : > { %v849_v34 = vrot.slane %v848_v28, 2  ;;  %v912_v35 = vadd.f32 %v911_v30, %v910_v13  ;;  %v897_v36 = vrot.slane %v896_v32, 4  ;;  %v855_v37 = vadd.f32 %v854_v44, %v853_v25 }
 0x24f   : > { %v835_v54 = vrot.slane %v834_v31, 2  ;;  %v917_v20 = vsel %vm642_vm10, %v867_v1, 0.0  ;;  %1298 = vpow2.f32 %v798_v11  ;;  %v888_v38 = vadd.f32 %v887_v12, %v886_v53 }
 0x250   : > { %v850_v39 = vadd.f32 %v849_v34, %v848_v28  ;;  %v898_v40 = vadd.f32 %v897_v36, %v896_v32  ;;  %v918_v41 = vrot.slane %v917_v20, 4  ;;  %v874_v43 = vadd.f32 %v873_v19, %v872_v8 }
 0x251   : > { %v880_v6 = vrot.slane %v879_v26, 1  ;;  %v836_v45 = vadd.f32 %v835_v54, %v834_v31  ;;  %v856_v46 = vrot.slane %v855_v37, 2  ;;  %v895_v48 = vadd.f32 %v894_v33, %v893_v15 }
 0x252   : > { %v1291_v42 = vpop.eup %1290  ;;  %v851_v50 = vrot.slane %v850_v39, 1  ;;  %v913_v51 = vrot.slane %v912_v35, 2  ;;  %v899_v0 = vrot.slane %v898_v40, 2  ;;  %v919_v53 = vadd.f32 %v918_v41, %v917_v20 }
 0x253   : > { %v1293_v47 = vpop.eup %1292  ;;  %v934_v49 = vmul.f32 %v1291_v42, %v888_v38  ;;  %v837_v57 = vrot.slane %v836_v45, 1  ;;  %v857_v58 = vadd.f32 %v856_v46, %v855_v37  ;;  %v881_v2 = vadd.f32 %v880_v6, %v879_v26 }
 0x254   : > { %v1295_v52 = vpop.eup %1294  ;;  %v932_v55 = vmul.f32 %v1293_v47, %v874_v43  ;;  %v852_v62 = vadd.f32 %v851_v50, %v850_v39  ;;  %v914_v4 = vadd.f32 %v913_v51, %v912_v35  ;;  %v900_v8 = vadd.f32 %v899_v0, %v898_v40 }
 0x255   : > { %v935_v61 = vmul.f32 %v1295_v52, %v895_v48  ;;  %v838_v3 = vadd.f32 %v837_v57, %v836_v45  ;;  %v858_v56 = vrot.slane %v857_v58, 1  ;;  %v942_v7 = vpack.c.bf16 %v934_v49, %v934_v49 }
 0x256   : > { %1300 = vrcp.f32 %v852_v62  ;;  %v940_v5 = vpack.c.bf16 %v932_v55, %v932_v55  ;;  %v920_v63 = vrot.slane %v919_v53, 2  ;;  %v915_v14 = vrot.slane %v914_v4, 1 }
 0x257   : > { %v1297_v59 = vpop.eup %1296  ;;  %1302 = vrcp.f32 %v838_v3  ;;  %v859_v9 = vadd.f32 %v858_v56, %v857_v58  ;;  %v943_v11 = vpack.c.bf16 %v935_v61, %v935_v61  ;;  %v966_v22 = vunpack.c.l.b16 %v942_v7 }
 0x258   : > { %v933_v60 = vmul.f32 %v1297_v59, %v881_v2  ;;  %v964_v16 = vunpack.c.l.b16 %v940_v5  ;;  %v921_v19 = vadd.f32 %v920_v63, %v919_v53  ;;  %v901_v24 = vrot.slane %v900_v8, 1  ;;  %v1155_v2 = vld [vmem:[%s1808_s4] ss:$0 sm:$0xff] }
 0x259   : > { %v1299_v10 = vpop.eup %1298  ;;  %1304 = vrcp.f32 %v859_v9  ;;  %v967_v17 = vunpack.c.l.b16 %v943_v11  ;;  %v916_v30 = vadd.f32 %v915_v14, %v914_v4 }
 0x25a   : > { %v941_v12 = vpack.c.bf16 %v933_v60, %v933_v60  ;;  %v839_v29 = vsel %vm642_vm10, %v1299_v10, 0.0  ;;  %v865_v15 = vmul.f32 %v1299_v10, %v1691_v27  ;;  %v922_v31 = vrot.slane %v921_v19, 1 }
 0x25b   : > { %v840_v21 = vrot.slane %v839_v29, 4  ;;  %v902_v1 = vadd.f32 %v901_v24, %v900_v8 }
 0x25c   : > { %v965_v18 = vunpack.c.l.b16 %v941_v12  ;;  %v903_v13 = vsel %vm642_vm10, %v865_v15, 0.0  ;;  %v923_v37 = vadd.f32 %v922_v31, %v921_v19 }
 0x25d   : > { %v841_v25 = vadd.f32 %v840_v21, %v839_v29  ;;  %v904_v26 = vrot.slane %v903_v13, 4 }
 0x25e   : > { %v972_v23 = vsel %vm438_vm2, %v965_v18, %v964_v16 }
 0x25f   : > { %v973_v28 = vsel %vm441_vm3, %v966_v22, %v972_v23  ;;  %v842_v32 = vrot.slane %v841_v25, 2  ;;  %v905_v33 = vadd.f32 %v904_v26, %v903_v13 }
 0x260   : > { %v974_v27 = vsel %vm444_vm4, %v967_v17, %v973_v28  ;;  %v1301_v44 = vpop.eup %1300 }
 0x261   : > { %v1303_v34 = vpop.eup %1302  ;;  %v938_v35 = vmul.f32 %v1301_v44, %v916_v30  ;;  %v843_v36 = vadd.f32 %v842_v32, %v841_v25  ;;  %v906_v40 = vrot.slane %v905_v33, 2 }
 0x262   : > { %v936_v54 = vmul.f32 %v1303_v34, %v902_v1 }
 0x263   : > { %v844_v20 = vrot.slane %v843_v36, 1  ;;  %v1305_v38 = vpop.eup %1304  ;;  %v907_v6 = vadd.f32 %v906_v40, %v905_v33  ;;  %v946_v50 = vpack.c.bf16 %v938_v35, %v938_v35 }
 0x264   : > { %v944_v39 = vpack.c.bf16 %v936_v54, %v936_v54  ;;  %v939_v41 = vmul.f32 %v1305_v38, %v923_v37 }
 0x265   : > { %v845_v42 = vadd.f32 %v844_v20, %v843_v36  ;;  %v908_v46 = vrot.slane %v907_v6, 1  ;;  %v970_v57 = vunpack.c.l.b16 %v946_v50 }
 0x266   : > { %v968_v43 = vunpack.c.l.b16 %v944_v39  ;;  %v947_v52 = vpack.c.bf16 %v939_v41, %v939_v41 }
 0x267   : > { %1306 = vrcp.f32 %v845_v42  ;;  %v909_v47 = vadd.f32 %v908_v46, %v907_v6 }
 0x268   : > { %v975_v45 = vsel %vm447_vm5, %v968_v43, %v974_v27  ;;  %v971_v58 = vunpack.c.l.b16 %v947_v52 }
 0x271   : > { %v1307_v49 = vpop.eup %1306 }
 0x272   : > { %v937_v48 = vmul.f32 %v1307_v49, %v909_v47 }
 0x274   : > { %v945_v51 = vpack.c.bf16 %v937_v48, %v937_v48 }
 0x276   : > { %v969_v55 = vunpack.c.l.b16 %v945_v51 }
 0x278   : > { %v976_v61 = vsel %vm450_vm6, %v969_v55, %v975_v45 }
 0x279   : > { %v977_v62 = vsel %vm453_vm7, %v970_v57, %v976_v61 }
 0x27a   : > { %v978_v0 = vsel %vm456_vm8, %v971_v58, %v977_v62 }
 0x27b   : > { %v979_v53 = vpack.c.b16 %v978_v0, %v978_v0 }
 0x27d   : > { %1201 = vmatmul.mubr.msk.bf16.vlgmr.msra.gmra.mrb[12].mxu1 %vm642_vm10, %v979_v53 }
 0x350   : > { %v1020_v3 = vpop.f32.mrb[12].mxu1 }
 0x351   : > { %v1021_v56 = vadd.f32 %v1155_v2, %v1020_v3  ;;  %v1202_v59 = vpop.f32.mrb[13].mxu1 }
 0x352   : > { %v1023_v4 = vpop.f32.mrb[14].mxu1 }
 0x353   : > { %v1203_v5 = vpop.f32.mrb[15].mxu1  ;;  %1026 = vst.msk [vmem:[%s284_s7] sm:$0xff] %vm347_vm1, %v1021_v56 }
 0x354   : > { %1379 = shalt.err (!%p1376_p7)
}
 0x355   : > { %s1380_s12 = scalar_lea.hbm %s1759_s20, 128  ;;  %s1384_s16 = scalar_lea.hbm %s1810_s6, 256 }
 0x356   : > { %p1381_p9 = scmp.ne.s32.totalorder %s1759_s20, %s1380_s12  ;;  %p1385_p5 = scmp.lt.u32.totalorder %s1759_s20, %s1810_s6 }
 0x357   : > { %p1386_p11 = scmp.lt.u32.totalorder %s1384_s16, %s1380_s12  ;;  %p1388_p4 = scmp.lt.u32.totalorder %s1380_s12, %s1759_s20 }
 0x358   : > { %p1382_p1 = pnand %p1381_p9, %p1576_p12 }
 0x359   : > { %p1387_p2 = por %p1386_p11, %p1385_p5 }
 0x35a   : > { %p1383_p0 = pneg %p1382_p1 }
 0x35b   : > { %p1389_p6 = por %p1388_p4, %p1387_p2 }
 0x35d   : > { %p1390_p8 = pnand %p1389_p6, %p1383_p0 }
 0x35f   : > { %1393 = shalt.err (!%p1390_p8)
}
 0x360   : > { %1211 = dma.vmem_to_hbm [thread:$0]  (%p1576_p12), %s1761_s8, 128, %s1759_s20, %s1028_s25  }
 0x361 PF: > { %s1053_s7 = sand.u32 1, %s1424_s21   ;;  %p1825_p10 = scmp.ne.s32.totalorder %s1815_s28, 0 }
 0x362   : > { %p1826_p13 = scmp.ge.s32.totalorder %s1436_s24, 2  ;;  %s1054_s27 = scalar_lea.sflag [#allocation4], %s1053_s7 }
 0x364   : > { %p1222_p3 = pnand %p1826_p13, %p1825_p10 }
 0x366   : > { %1419 = dma.done.wait (!%p1222_p3), %s1054_s27, 128  }
 0x367   : > { %1421 = vsyncadd (!%p1222_p3), %s1054_s27, 4294967168  ;;  %p20_p7 = scmp.ge.s32.totalorder %s1538_s9, 4   ;;  %s1827_s21 = smov %s1428_s22 }
 0x368   : > { %s1828_s22 = smov %s1432_s23  ;;  %s1829_s23 = smov %s1572_s13 }
 0x369   : > { %s1830_s24 = smov %s1538_s9  ;;  %22 = sbr.rel (!%p20_p7) target bundleno = 6 (0x6), region = 93 }
 0x370   :  { %1059 = vsyncpa [#allocation3], 1 }
 0x371   :  { %1061 = vsyncpa [#allocation3 + $0x1], 1 }
 0x372   :  { %1062 = vsyncpa [#allocation6], 1 }
 0x373   :  { %1063 = vsyncpa [#allocation4], 1 }
 0x374   :  { %1065 = vsyncpa [#allocation4 + $0x1], 1 }

</bundles_post_ra>
